<compile_context>
chip_gen: v6e
topology: v6e:2x2x1
jax: 0.10.0
libtpu: 0.0.40
codegen_flags: <defaults>
</compile_context>

<pallas_src>
import functools

import jax
import jax.numpy as jnp
from jax.experimental import pallas as pl
from jax.experimental.pallas import tpu as pltpu

IN_DIM, H1, H2, OUT_DIM = 128, 20, 30, 2
PAD = 128  # lane-padded width for hidden / output activations


def _round_up(n, m):
    return ((n + m - 1) // m) * m


def dnn_kernel(x_ref, w1_ref, b1_ref, w2_ref, b2_ref, w3_ref, b3_ref, o_ref):
    # Whole MLP hot path fused: 3 bf16 matmuls (f32 acc) + bias adds + 2 ReLUs.
    x = x_ref[...]  # bf16 (tile_b, 128)

    h1 = jnp.dot(x, w1_ref[...], preferred_element_type=jnp.float32) + b1_ref[...]
    h1 = jnp.maximum(h1, 0.0).astype(jnp.bfloat16)

    h2 = jnp.dot(h1, w2_ref[...], preferred_element_type=jnp.float32) + b2_ref[...]
    h2 = jnp.maximum(h2, 0.0).astype(jnp.bfloat16)

    out = jnp.dot(h2, w3_ref[...], preferred_element_type=jnp.float32) + b3_ref[...]
    o_ref[...] = out.astype(o_ref.dtype)  # lane-dense (tile_b, 128) store


def prep_params(params):
    """Zero-pad hidden/output dims to 128 lanes; weights -> bf16, biases -> f32."""
    w1, b1, w2, b2, w3, b3 = params

    def pad_w(w, rows, cols):
        out = jnp.zeros((rows, cols), jnp.float32)
        out = out.at[: w.shape[0], : w.shape[1]].set(w)
        return out.astype(jnp.bfloat16)

    def pad_b(b, cols):
        out = jnp.zeros((1, cols), jnp.float32)
        return out.at[:, : b.shape[1]].set(b)

    return (
        pad_w(w1, IN_DIM, PAD), pad_b(b1, PAD),   # (128,128) bf16, (1,128) f32
        pad_w(w2, PAD, PAD),    pad_b(b2, PAD),
        pad_w(w3, PAD, PAD),    pad_b(b3, PAD),
    )


@functools.partial(jax.jit, static_argnames=("tile_b",))
def dnn_forward(x, padded_params, *, tile_b=512):
    """x: (B, 128) float32 -> (B, 2) float32."""
    B = x.shape[0]
    # Clamp tile to the (8-rounded) batch so tiny batches don't over-pad.
    tile_b = max(8, min(tile_b, _round_up(B, 8)))
    B_pad = _round_up(B, tile_b)
    if B_pad != B:
        x = jnp.pad(x, ((0, B_pad - B), (0, 0)))
    x = x.astype(jnp.bfloat16)

    grid = (B_pad // tile_b,)

    # Weights/biases are tiny and grid-invariant: whole array every step.
    full = lambda shape: pl.BlockSpec(shape, lambda i: (0,) * len(shape))

    cost = pl.CostEstimate(
        flops=int(2 * B_pad * (IN_DIM * PAD + PAD * PAD + PAD * PAD)),
        transcendentals=0,
        bytes_accessed=int(
            B_pad * IN_DIM * 2          # bf16 x stream (dominant)
            + B_pad * PAD * 4           # f32 lane-padded output
            + 3 * PAD * PAD * 2         # bf16 weights (resident)
            + 3 * PAD * 4               # f32 biases
        ),
    )

    out_padded = pl.pallas_call(
        dnn_kernel,
        out_shape=jax.ShapeDtypeStruct((B_pad, PAD), jnp.float32),
        grid_spec=pltpu.PrefetchScalarGridSpec(
            num_scalar_prefetch=0,
            grid=grid,
            in_specs=[
                pl.BlockSpec((tile_b, IN_DIM), lambda i: (i, 0)),
                full((IN_DIM, PAD)),
                full((1, PAD)),
                full((PAD, PAD)),
                full((1, PAD)),
                full((PAD, PAD)),
                full((1, PAD)),
            ],
            out_specs=pl.BlockSpec((tile_b, PAD), lambda i: (i, 0)),
        ),
        compiler_params=pltpu.CompilerParams(
            dimension_semantics=("parallel",),
        ),
        cost_estimate=cost,
    )(x, *padded_params)

    # Slice off batch padding and the lane padding (only first 2 lanes valid).
    return out_padded[:B, :OUT_DIM]


def init_params(key):
    """Deterministic init mirroring nn.Linear default (uniform +/- 1/sqrt(fan_in)).
    Stored as (in_features, out_features) so the kernel does x @ W + b."""
    ks = jax.random.split(key, 6)

    def linear(kw, kb, fan_in, fan_out):
        bound = 1.0 / jnp.sqrt(fan_in)
        w = jax.random.uniform(kw, (fan_in, fan_out), jnp.float32, -bound, bound)
        b = jax.random.uniform(kb, (1, fan_out), jnp.float32, -bound, bound)
        return w, b

    w1, b1 = linear(ks[0], ks[1], IN_DIM, H1)
    w2, b2 = linear(ks[2], ks[3], H1, H2)
    w3, b3 = linear(ks[4], ks[5], H2, OUT_DIM)
    return (w1, b1, w2, b2, w3, b3)


def dnn_forward_ref(x, params):
    w1, b1, w2, b2, w3, b3 = params
    h1 = jnp.maximum(x @ w1 + b1, 0.0)
    h2 = jnp.maximum(h1 @ w2 + b2, 0.0)
    return h2 @ w3 + b3


if __name__ == "__main__":
    key = jax.random.PRNGKey(0)
    kx, kp = jax.random.split(key)

    B = 8  # small demo batch; the kernel clamps tile_b accordingly
    x = jax.random.normal(kx, (B, IN_DIM), jnp.float32)
    params = init_params(kp)
    padded_params = prep_params(params)

    out = dnn_forward(x, padded_params)
    out = jax.block_until_ready(out)

    ref = dnn_forward_ref(x, params)  # full f32 reference
    assert out.shape == (B, OUT_DIM)
    # bf16 inputs/weights with f32 accumulation -> loosened tolerance.
    assert jnp.allclose(out, ref, atol=3e-2, rtol=3e-2), (
        f"max abs err {jnp.max(jnp.abs(out - ref))}")

    print("KERNEL_OK")
</pallas_src>

<mosaic_0001>
module attributes {stable_mosaic.version = 11 : i64} {
  func.func @dnn_kernel(%arg0: i32, %arg1: memref<8x128xbf16, #tpu.memory_space<vmem>>, %arg2: memref<128x128xbf16, #tpu.memory_space<vmem>>, %arg3: memref<1x128xf32, #tpu.memory_space<vmem>>, %arg4: memref<128x128xbf16, #tpu.memory_space<vmem>>, %arg5: memref<1x128xf32, #tpu.memory_space<vmem>>, %arg6: memref<128x128xbf16, #tpu.memory_space<vmem>>, %arg7: memref<1x128xf32, #tpu.memory_space<vmem>>, %arg8: memref<8x128xf32, #tpu.memory_space<vmem>>) attributes {dimension_semantics = [#tpu.dimension_semantics<parallel>], iteration_bounds = array<i64: 1>, scalar_prefetch = 0 : i64, scratch_operands = 0 : i64, tpu.core_type = #tpu.core_type<tc>, window_params = [{transform_indices = @transform_0, window_bounds = array<i64: 8, 128>}, {pipeline_mode = #tpu.pipeline_mode<synchronous>, transform_indices = @transform_1, window_bounds = array<i64: 128, 128>}, {pipeline_mode = #tpu.pipeline_mode<synchronous>, transform_indices = @transform_2, window_bounds = array<i64: 1, 128>}, {pipeline_mode = #tpu.pipeline_mode<synchronous>, transform_indices = @transform_3, window_bounds = array<i64: 128, 128>}, {pipeline_mode = #tpu.pipeline_mode<synchronous>, transform_indices = @transform_4, window_bounds = array<i64: 1, 128>}, {pipeline_mode = #tpu.pipeline_mode<synchronous>, transform_indices = @transform_5, window_bounds = array<i64: 128, 128>}, {pipeline_mode = #tpu.pipeline_mode<synchronous>, transform_indices = @transform_6, window_bounds = array<i64: 1, 128>}, {transform_indices = @transform_7, window_bounds = array<i64: 8, 128>}]} {
    %c0 = arith.constant 0 : index
    %c0_0 = arith.constant 0 : index
    %0 = vector.load %arg1[%c0, %c0_0] : memref<8x128xbf16, #tpu.memory_space<vmem>>, vector<8x128xbf16>
    %c0_1 = arith.constant 0 : index
    %c0_2 = arith.constant 0 : index
    %1 = vector.load %arg2[%c0_1, %c0_2] : memref<128x128xbf16, #tpu.memory_space<vmem>>, vector<128x128xbf16>
    %cst = arith.constant dense<0.000000e+00> : vector<8x128xf32>
    %2 = tpu.matmul %0, %1, %cst {dimension_numbers = #tpu.dot_dimension_numbers<[1], [0], [0], [1], [0, 0, 1, 1], [], []>} : vector<8x128xbf16>, vector<128x128xbf16>, vector<8x128xf32> -> vector<8x128xf32>
    %c0_3 = arith.constant 0 : index
    %c0_4 = arith.constant 0 : index
    %3 = vector.load %arg3[%c0_3, %c0_4] : memref<1x128xf32, #tpu.memory_space<vmem>>, vector<1x128xf32>
    %4 = vector.broadcast %3 : vector<1x128xf32> to vector<8x128xf32>
    %5 = arith.addf %2, %4 : vector<8x128xf32>
    %cst_5 = arith.constant 0.000000e+00 : f32
    %6 = vector.broadcast %cst_5 : f32 to vector<8x128xf32>
    %7 = arith.maximumf %5, %6 : vector<8x128xf32>
    %8 = arith.truncf %7 : vector<8x128xf32> to vector<8x128xbf16>
    %c0_6 = arith.constant 0 : index
    %c0_7 = arith.constant 0 : index
    %9 = vector.load %arg4[%c0_6, %c0_7] : memref<128x128xbf16, #tpu.memory_space<vmem>>, vector<128x128xbf16>
    %cst_8 = arith.constant dense<0.000000e+00> : vector<8x128xf32>
    %10 = tpu.matmul %8, %9, %cst_8 {dimension_numbers = #tpu.dot_dimension_numbers<[1], [0], [0], [1], [0, 0, 1, 1], [], []>} : vector<8x128xbf16>, vector<128x128xbf16>, vector<8x128xf32> -> vector<8x128xf32>
    %c0_9 = arith.constant 0 : index
    %c0_10 = arith.constant 0 : index
    %11 = vector.load %arg5[%c0_9, %c0_10] : memref<1x128xf32, #tpu.memory_space<vmem>>, vector<1x128xf32>
    %12 = vector.broadcast %11 : vector<1x128xf32> to vector<8x128xf32>
    %13 = arith.addf %10, %12 : vector<8x128xf32>
    %cst_11 = arith.constant 0.000000e+00 : f32
    %14 = vector.broadcast %cst_11 : f32 to vector<8x128xf32>
    %15 = arith.maximumf %13, %14 : vector<8x128xf32>
    %16 = arith.truncf %15 : vector<8x128xf32> to vector<8x128xbf16>
    %c0_12 = arith.constant 0 : index
    %c0_13 = arith.constant 0 : index
    %17 = vector.load %arg6[%c0_12, %c0_13] : memref<128x128xbf16, #tpu.memory_space<vmem>>, vector<128x128xbf16>
    %cst_14 = arith.constant dense<0.000000e+00> : vector<8x128xf32>
    %18 = tpu.matmul %16, %17, %cst_14 {dimension_numbers = #tpu.dot_dimension_numbers<[1], [0], [0], [1], [0, 0, 1, 1], [], []>} : vector<8x128xbf16>, vector<128x128xbf16>, vector<8x128xf32> -> vector<8x128xf32>
    %c0_15 = arith.constant 0 : index
    %c0_16 = arith.constant 0 : index
    %19 = vector.load %arg7[%c0_15, %c0_16] : memref<1x128xf32, #tpu.memory_space<vmem>>, vector<1x128xf32>
    %20 = vector.broadcast %19 : vector<1x128xf32> to vector<8x128xf32>
    %21 = arith.addf %18, %20 : vector<8x128xf32>
    %c0_17 = arith.constant 0 : index
    %c0_18 = arith.constant 0 : index
    %22 = vector.load %arg8[%c0_17, %c0_18] : memref<8x128xf32, #tpu.memory_space<vmem>>, vector<8x128xf32>
    tpu.vector_store %arg8[%c0_17, %c0_18], %21 {strides = array<i32>} : memref<8x128xf32, #tpu.memory_space<vmem>>, vector<8x128xf32>,
    return
  }
  func.func @transform_0(%arg0: i32) -> (i32, i32) {
    %c0_i32 = arith.constant 0 : i32
    %c0_i32_0 = arith.constant 0 : i32
    return %arg0, %c0_i32 : i32, i32
  }
  func.func @transform_1(%arg0: i32) -> (i32, i32) {
    %c0_i32 = arith.constant 0 : i32
    %c0_i32_0 = arith.constant 0 : i32
    %c0_i32_1 = arith.constant 0 : i32
    return %c0_i32, %c0_i32_0 : i32, i32
  }
  func.func @transform_2(%arg0: i32) -> (i32, i32) {
    %c0_i32 = arith.constant 0 : i32
    %c0_i32_0 = arith.constant 0 : i32
    %c0_i32_1 = arith.constant 0 : i32
    return %c0_i32, %c0_i32_0 : i32, i32
  }
  func.func @transform_3(%arg0: i32) -> (i32, i32) {
    %c0_i32 = arith.constant 0 : i32
    %c0_i32_0 = arith.constant 0 : i32
    %c0_i32_1 = arith.constant 0 : i32
    return %c0_i32, %c0_i32_0 : i32, i32
  }
  func.func @transform_4(%arg0: i32) -> (i32, i32) {
    %c0_i32 = arith.constant 0 : i32
    %c0_i32_0 = arith.constant 0 : i32
    %c0_i32_1 = arith.constant 0 : i32
    return %c0_i32, %c0_i32_0 : i32, i32
  }
  func.func @transform_5(%arg0: i32) -> (i32, i32) {
    %c0_i32 = arith.constant 0 : i32
    %c0_i32_0 = arith.constant 0 : i32
    %c0_i32_1 = arith.constant 0 : i32
    return %c0_i32, %c0_i32_0 : i32, i32
  }
  func.func @transform_6(%arg0: i32) -> (i32, i32) {
    %c0_i32 = arith.constant 0 : i32
    %c0_i32_0 = arith.constant 0 : i32
    %c0_i32_1 = arith.constant 0 : i32
    return %c0_i32, %c0_i32_0 : i32, i32
  }
  func.func @transform_7(%arg0: i32) -> (i32, i32) {
    %c0_i32 = arith.constant 0 : i32
    %c0_i32_0 = arith.constant 0 : i32
    return %arg0, %c0_i32 : i32, i32
  }
}

</mosaic_0001>

<bundles_post_ra>
// kernel: dnn_forward.1
= control target key start
LH: loop header
LB: loop body
LE: loop exit
PB: predicated region body
PF: predicated region fallthrough
CT: control target
= control target key end

     0   :  { %12 = vsyncpa [#allocation3], 0  ;;  %s723_s0 = inlined_call_operand.vmem [shape: bf16[8,128], index: 0, kind: input, shape index: {}]   ;;  %s724_s1 = inlined_call_operand.hbm [shape: bf16[128,128], index: 1, kind: input, shape index: {}]   ;;  %s725_s2 = inlined_call_operand.vmem [shape: f32[1,128], index: 2, kind: input, shape index: {}]   ;;  %s726_s3 = inlined_call_operand.hbm [shape: bf16[128,128], index: 3, kind: input, shape index: {}]   ;;  %s727_s4 = inlined_call_operand.vmem [shape: f32[1,128], index: 4, kind: input, shape index: {}]   ;;  %s728_s5 = inlined_call_operand.hbm [shape: bf16[128,128], index: 5, kind: input, shape index: {}]   ;;  %s729_s6 = inlined_call_operand.vmem [shape: f32[1,128], index: 6, kind: input, shape index: {}]   ;;  %s730_s7 = inlined_call_operand.vmem [shape: f32[8,128], index: 7, kind: output, shape index: {}]  }
   0x1   :  { %13 = vsyncpa [#allocation5], 0  ;;  %s622_s24 = smov [#allocation4]   ;;  %s623_s26 = smov [#allocation2]  }
   0x2   :  { %s35_s25 = sshll.u32 %s622_s24, 4  ;;  %s21_s27 = sshll.u32 %s623_s26, 4  ;;  %s36_s25 = int_to_ptr.vmem [resolvable:$true] %s35_s25  ;;  %s22_s27 = int_to_ptr.vmem [resolvable:$true] %s21_s27 }
   0x3   :  { %s566_s28 = scalar_lea.vmem %s36_s25, 1024  ;;  %p571_p1 = scmp.lt.s32.totalorder %s36_s25, %s36_s25 }
   0x4   :  { %p567_p0 = scmp.ne.s32.totalorder %s36_s25, %s566_s28  ;;  %p572_p2 = scmp.lt.s32.totalorder %s566_s28, %s566_s28 }
   0x6   :  { %p573_p3 = por %p572_p2, %p571_p1 }
   0x8   :  { %p574_p4 = pnand %p573_p3, %p567_p0 }
   0xa   :  { %577 = shalt.err (!%p574_p4)
}
   0xb   :  { %s624_s29 = smov 64   ;;  %s625_s30 = smov 4  }
   0xc   :  { %41 = dma.hbm_to_vmem [thread:$0]  %s726_s3, 1024, %s36_s25, [#allocation5], %s624_s29, %s624_s29, %s625_s30  }
   0xd   :  { %s586_s10 = scalar_lea.vmem %s22_s27, 1024  ;;  %p591_p6 = scmp.lt.s32.totalorder %s22_s27, %s22_s27 }
   0xe   :  { %p587_p5 = scmp.ne.s32.totalorder %s22_s27, %s586_s10  ;;  %p592_p7 = scmp.lt.s32.totalorder %s586_s10, %s586_s10 }
  0x10   :  { %p593_p8 = por %p592_p7, %p591_p6 }
  0x12   :  { %p594_p9 = pnand %p593_p8, %p587_p5 }
  0x14   :  { %597 = shalt.err (!%p594_p9)
}
  0x15   :  { %27 = dma.hbm_to_vmem [thread:$0]  %s724_s1, 1024, %s22_s27, [#allocation3], %s624_s29, %s624_s29, %s625_s30  }
  0x16   :  { %s626_s13 = smov [#allocation6]  }
  0x17   :  { %s49_s14 = sshll.u32 %s626_s13, 4  ;;  %s50_s14 = int_to_ptr.vmem [resolvable:$true] %s49_s14 }
  0x18   :  { %s606_s15 = scalar_lea.vmem %s50_s14, 1024  ;;  %p611_p11 = scmp.lt.s32.totalorder %s50_s14, %s50_s14 }
  0x19   :  { %p607_p10 = scmp.ne.s32.totalorder %s50_s14, %s606_s15  ;;  %p612_p12 = scmp.lt.s32.totalorder %s606_s15, %s606_s15 }
  0x1b   :  { %p613_p13 = por %p612_p12, %p611_p11 }
  0x1d   :  { %p614_p0 = pnand %p613_p13, %p607_p10 }
  0x1f   :  { %617 = shalt.err (!%p614_p0)
}
  0x20   :  { %55 = dma.hbm_to_vmem [thread:$0]  %s728_s5, 1024, %s50_s14, [#allocation5], %s624_s29, %s624_s29, %s625_s30  }
  0x21   :  { %618 = dma.done.wait [#allocation3], 1024  }
  0x22   :  { %619 = vsyncadd [#allocation3], 4294966272 }
  0x23   :  { %620 = dma.done.wait [#allocation5], 2048  }
  0x24   :  { %621 = vsyncadd [#allocation5], 4294965248  ;;  %v627_v0 = vmov 0.0   ;;  %vm628_vm0 = vmmov 0   ;;  %v534_v1 = vld [vmem:[#allocation2 + $0x38] sm:$0xff]   ;;  %v535_v2 = vld [vmem:[#allocation2 + $0x30] sm:$0xff]  }
  0x25   :  { %467 = vmatprep.subr.bf16.mxu0 %v627_v0  ;;  %483 = vmatprep.mubr.msk.bf16.mxu0 %vm628_vm0, %v627_v0  ;;  %v536_v3 = vld [vmem:[#allocation2 + $0x28] sm:$0xff]   ;;  %v542_v4 = vld [vmem:[#allocation4 + $0x38] sm:$0xff]   ;;  %v537_v5 = vld [vmem:[#allocation2 + $0x20] sm:$0xff]  }
  0x26   :  { %487 = vmatprep.subr.bf16.mxu1 %v627_v0  ;;  %503 = vmatprep.mubr.msk.bf16.mxu1 %vm628_vm0, %v627_v0  ;;  %v543_v6 = vld [vmem:[#allocation4 + $0x30] sm:$0xff]   ;;  %v538_v7 = vld [vmem:[#allocation2 + $0x18] sm:$0xff]   ;;  %v544_v8 = vld [vmem:[#allocation4 + $0x28] sm:$0xff]  }
  0x27   :  { %468 = vmatpush3.bf16.msra.mxu0 %v534_v1  ;;  %488 = vmatpush3.bf16.msra.mxu1 %v542_v4  ;;  %v539_v9 = vld [vmem:[#allocation2 + $0x10] sm:$0xff]   ;;  %v545_v10 = vld [vmem:[#allocation4 + $0x20] sm:$0xff]   ;;  %v540_v11 = vld [vmem:[#allocation2 + $0x8] sm:$0xff]  }
  0x28   :  { %469 = vmatprep.subr.bf16.mxu0 %v627_v0  ;;  %489 = vmatprep.subr.bf16.mxu1 %v627_v0  ;;  %v546_v12 = vld [vmem:[#allocation4 + $0x18] sm:$0xff]   ;;  %v541_v13 = vld [vmem:[#allocation2] sm:$0xff]   ;;  %v547_v14 = vld [vmem:[#allocation4 + $0x10] sm:$0xff]  }
  0x29   :  { %v68_v15 = vld [vmem:[%s723_s0] sm:$0xf]  ;;  %v548_v16 = vld [vmem:[#allocation4 + $0x8] sm:$0xff]   ;;  %v550_v18 = vld [vmem:[#allocation6 + $0x38] sm:$0xff]  }
  0x2a   :  { %v549_v17 = vld [vmem:[#allocation4] sm:$0xff]   ;;  %v551_v19 = vld [vmem:[#allocation6 + $0x30] sm:$0xff]   ;;  %v552_v20 = vld [vmem:[#allocation6 + $0x28] sm:$0xff]  }
  0x2b   :  { %470 = vmatpush3.bf16.msra.mxu0 %v535_v2  ;;  %490 = vmatpush3.bf16.msra.mxu1 %v543_v6  ;;  %v553_v21 = vld [vmem:[#allocation6 + $0x20] sm:$0xff]   ;;  %v554_v22 = vld [vmem:[#allocation6 + $0x18] sm:$0xff]   ;;  %v555_v23 = vld [vmem:[#allocation6 + $0x10] sm:$0xff]  }
  0x2c   :  { %471 = vmatprep.subr.bf16.mxu0 %v627_v0  ;;  %491 = vmatprep.subr.bf16.mxu1 %v627_v0  ;;  %v413_v24 = vld [vmem:[%s725_s2] ss:$0 sm:$0xff]  ;;  %v556_v32 = vld [vmem:[#allocation6 + $0x8] sm:$0xff]  }
  0x2d   :  { %v557_v33 = vld [vmem:[#allocation6] sm:$0xff]  }
  0x2e   :  { %v422_v34 = vld [vmem:[%s727_s4] ss:$0 sm:$0xff] }
  0x2f   :  { %472 = vmatpush3.bf16.msra.mxu0 %v536_v3  ;;  %492 = vmatpush3.bf16.msra.mxu1 %v544_v8  ;;  %v431_v42 = vld [vmem:[%s729_s6] ss:$0 sm:$0xff] }
  0x30   :  { %473 = vmatprep.subr.bf16.mxu0 %v627_v0  ;;  %493 = vmatprep.subr.bf16.mxu1 %v627_v0 }
  0x33   :  { %474 = vmatpush3.bf16.msra.mxu0 %v537_v5  ;;  %494 = vmatpush3.bf16.msra.mxu1 %v545_v10 }
  0x34   :  { %475 = vmatprep.subr.bf16.mxu0 %v627_v0  ;;  %495 = vmatprep.subr.bf16.mxu1 %v627_v0 }
  0x37   :  { %476 = vmatpush3.bf16.msra.mxu0 %v538_v7  ;;  %496 = vmatpush3.bf16.msra.mxu1 %v546_v12 }
  0x38   :  { %477 = vmatprep.subr.bf16.mxu0 %v627_v0  ;;  %497 = vmatprep.subr.bf16.mxu1 %v627_v0 }
  0x3b   :  { %478 = vmatpush3.bf16.msra.mxu0 %v539_v9  ;;  %498 = vmatpush3.bf16.msra.mxu1 %v547_v14 }
  0x3c   :  { %479 = vmatprep.subr.bf16.mxu0 %v627_v0  ;;  %499 = vmatprep.subr.bf16.mxu1 %v627_v0 }
  0x3f   :  { %480 = vmatpush3.bf16.msra.mxu0 %v540_v11  ;;  %500 = vmatpush3.bf16.msra.mxu1 %v548_v16 }
  0x40   :  { %481 = vmatprep.subr.bf16.mxu0 %v627_v0  ;;  %501 = vmatprep.subr.bf16.mxu1 %v627_v0 }
  0x43   :  { %482 = vmatpush3.bf16.msra.mxu0 %v541_v13  ;;  %502 = vmatpush3.bf16.msra.mxu1 %v549_v17 }
  0x44   :  { %507 = vmatprep.subr.bf16.mxu0 %v627_v0 }
  0x46   :  { %484 = vmatmul.mubr.bf16.vlgmr.msra.gmra.mxu0 %v68_v15 }
  0x47   :  { %523 = vmatprep.mubr.msk.bf16.mxu0 %vm628_vm0, %v627_v0  ;;  %508 = vmatpush3.bf16.msra.mxu0 %v550_v18 }
  0x48   :  { %509 = vmatprep.subr.bf16.mxu0 %v627_v0 }
  0x4b   :  { %510 = vmatpush3.bf16.msra.mxu0 %v551_v19 }
  0x4c   :  { %511 = vmatprep.subr.bf16.mxu0 %v627_v0 }
  0x4f   :  { %512 = vmatpush3.bf16.msra.mxu0 %v552_v20 }
  0x50   :  { %513 = vmatprep.subr.bf16.mxu0 %v627_v0 }
  0x53   :  { %514 = vmatpush3.bf16.msra.mxu0 %v553_v21 }
  0x54   :  { %515 = vmatprep.subr.bf16.mxu0 %v627_v0 }
  0x57   :  { %516 = vmatpush3.bf16.msra.mxu0 %v554_v22 }
  0x58   :  { %517 = vmatprep.subr.bf16.mxu0 %v627_v0 }
  0x5b   :  { %518 = vmatpush3.bf16.msra.mxu0 %v555_v23 }
  0x5c   :  { %519 = vmatprep.subr.bf16.mxu0 %v627_v0 }
  0x5f   :  { %520 = vmatpush3.bf16.msra.mxu0 %v556_v32 }
  0x60   :  { %521 = vmatprep.subr.bf16.mxu0 %v627_v0 }
  0x63   :  { %522 = vmatpush3.bf16.msra.mxu0 %v557_v33 }
 0x106   :  { %v174_v25 = vpop.f32.mrf.mxu0 }
 0x107   :  { %v175_v26 = vadd.f32 %v413_v24, %v174_v25 }
 0x108   :  { %v485_v27 = vpop.f32.mrf.mxu0 }
 0x109   :  { %v180_v28 = vmax.f32 %v175_v26, 0.0 }
 0x10a   :  { %v177_v29 = vpop.f32.mrf.mxu0 }
 0x10b   :  { %v181_v30 = vpack.c.bf16 %v180_v28, %v180_v28 }
 0x10c   :  { %v486_v31 = vpop.f32.mrf.mxu0 }
 0x10d   :  { %504 = vmatmul.mubr.bf16.vlgmr.msra.gmra.mxu1 %v181_v30 }
 0x1cd   :  { %v287_v35 = vpop.f32.mrf.mxu1 }
 0x1ce   :  { %v288_v36 = vadd.f32 %v422_v34, %v287_v35 }
 0x1cf   :  { %v505_v37 = vpop.f32.mrf.mxu1 }
 0x1d0   :  { %v293_v38 = vmax.f32 %v288_v36, 0.0 }
 0x1d1   :  { %v290_v39 = vpop.f32.mrf.mxu1 }
 0x1d2   :  { %v294_v40 = vpack.c.bf16 %v293_v38, %v293_v38 }
 0x1d3   :  { %v506_v41 = vpop.f32.mrf.mxu1 }
 0x1d4   :  { %524 = vmatmul.mubr.bf16.vlgmr.msra.gmra.mxu0 %v294_v40 }
 0x294   :  { %v400_v43 = vpop.f32.mrf.mxu0 }
 0x295   :  { %v401_v44 = vadd.f32 %v431_v42, %v400_v43 }
 0x296   :  { %v525_v45 = vpop.f32.mrf.mxu0 }
 0x297   :  { %406 = vst [vmem:[%s730_s7] sm:$0xff] %v401_v44 }
 0x298   :  { %v403_v46 = vpop.f32.mrf.mxu0 }
 0x29a   :  { %v526_v47 = vpop.f32.mrf.mxu0 }
 0x29b   :  { %411 = vsyncpa [#allocation3], 1 }
 0x29c   :  { %412 = vsyncpa [#allocation5], 1 }

</bundles_post_ra>
